<compile_context>
chip_gen: v7x
topology: tpu7x:2x2x1
jax: 0.10.0
libtpu: 0.0.40
codegen_flags: <defaults>
</compile_context>

<pallas_src>
import jax
import jax.numpy as jnp
from jax.experimental import pallas as pl
from jax.experimental.pallas import tpu as pltpu


def _round_up(x, m):
    return ((x + m - 1) // m) * m


def encoder_kernel(x_ref,
                   w1_ref, b1_ref,
                   w2_ref, b2_ref,
                   w3_ref, b3_ref,
                   wh_ref, bh_ref,
                   out_ref):
    # Cast x to the compute dtype inside the kernel (rides free VPU slots;
    # avoids a separate wrapper-side astype pass over HBM).
    x = x_ref[...].astype(w1_ref.dtype)

    # linear1 + relu  (bf16 MXU matmul, f32 accumulate, f32 bias add)
    h = jnp.dot(x, w1_ref[...],
                preferred_element_type=jnp.float32) + b1_ref[...]
    h = jnp.maximum(h, 0.0).astype(w2_ref.dtype)

    # linear2 + relu
    h = jnp.dot(h, w2_ref[...],
                preferred_element_type=jnp.float32) + b2_ref[...]
    h = jnp.maximum(h, 0.0).astype(w3_ref.dtype)

    # linear3 + relu
    h = jnp.dot(h, w3_ref[...],
                preferred_element_type=jnp.float32) + b3_ref[...]
    h = jnp.maximum(h, 0.0).astype(wh_ref.dtype)

    # Fused (and lane-padded to 128) mu/var head: one matmul, unmasked stores.
    out_ref[...] = (jnp.dot(h, wh_ref[...],
                            preferred_element_type=jnp.float32)
                    + bh_ref[...]).astype(out_ref.dtype)


def prepare_params(params, compute_dtype=jnp.bfloat16, head_lanes=128):
    """One-time glue: transpose [out,in]->[in,out], cast to bf16, reshape
    biases to (1,out) f32, concatenate the mu/var heads and zero-pad the
    fused head to a lane-dense (multiple of 128) width."""
    def wt(w):
        return jnp.asarray(w, jnp.float32).T.astype(compute_dtype)

    def b2d(b):
        return jnp.asarray(b, jnp.float32).reshape(1, -1)

    latent_dim = params["mu_w"].shape[0]
    w_head = jnp.concatenate([wt(params["mu_w"]), wt(params["var_w"])], axis=1)
    b_head = jnp.concatenate([b2d(params["mu_b"]), b2d(params["var_b"])], axis=1)

    head_out = _round_up(max(2 * latent_dim, head_lanes), head_lanes)
    pad = head_out - 2 * latent_dim
    if pad > 0:
        w_head = jnp.pad(w_head, ((0, 0), (0, pad)))
        b_head = jnp.pad(b_head, ((0, 0), (0, pad)))

    return {
        "w1": wt(params["w1"]), "b1": b2d(params["b1"]),
        "w2": wt(params["w2"]), "b2": b2d(params["b2"]),
        "w3": wt(params["w3"]), "b3": b2d(params["b3"]),
        "w_head": w_head, "b_head": b_head,
        "latent_dim": latent_dim,
        "head_out": head_out,
    }


def _pick_bm(batch, block_m):
    """Pick a batch tile size that (a) divides the batch when possible (so no
    padded copy of x is materialized), (b) is a multiple of 8 whenever it is
    not the full batch extent, and (c) gives >=2 grid steps for mid-size
    batches so v7x's two TensorCores both get work."""
    if batch <= block_m:
        # Split into two tiles for v7x megacore when cleanly splittable.
        if batch >= 16 and batch % 16 == 0:
            return batch // 2
        return batch                      # single full-extent block
    # batch > block_m: search downward for a multiple of 8 that divides batch.
    bm = block_m
    while bm >= 8:
        if batch % bm == 0:
            return bm
        bm -= 8
    return block_m                        # fallback: minimal padding needed


def encoder_forward(x, prep, *, block_m=512):
    """x: [batch, input_dim] (f32).  prep: output of prepare_params."""
    batch, input_dim = x.shape
    latent_dim = prep["latent_dim"]
    head_out = prep["head_out"]

    block_m = _round_up(block_m, 8)
    bm = _pick_bm(batch, block_m)
    padded = _round_up(batch, bm)
    x_in = x if padded == batch else jnp.pad(x, ((0, padded - batch), (0, 0)))
    grid = (padded // bm,)

    # Weights/biases: full-array blocks, constant index -> resident in VMEM.
    def const_spec(a):
        nd = a.ndim
        return pl.BlockSpec(a.shape, lambda i, _nd=nd: (0,) * _nd)

    in_specs = [
        pl.BlockSpec((bm, input_dim), lambda i: (i, 0)),       # x tile (f32)
        const_spec(prep["w1"]), const_spec(prep["b1"]),
        const_spec(prep["w2"]), const_spec(prep["b2"]),
        const_spec(prep["w3"]), const_spec(prep["b3"]),
        const_spec(prep["w_head"]), const_spec(prep["b_head"]),
    ]
    out_specs = pl.BlockSpec((bm, head_out), lambda i: (i, 0))

    fused = pl.pallas_call(
        encoder_kernel,
        out_shape=jax.ShapeDtypeStruct((padded, head_out), jnp.float32),
        grid=grid,
        in_specs=in_specs,
        out_specs=out_specs,
        compiler_params=pltpu.CompilerParams(
            dimension_semantics=("parallel",)),   # v7x: shard batch over 2 TCs
    )(x_in,
      prep["w1"], prep["b1"],
      prep["w2"], prep["b2"],
      prep["w3"], prep["b3"],
      prep["w_head"], prep["b_head"])

    fused = fused[:batch]
    return fused[:, :latent_dim], fused[:, latent_dim:2 * latent_dim]


def init_params(key, input_dim, hidden_dim1, hidden_dim2, hidden_dim3, latent_dim):
    """Deterministic synthetic parameters with PyTorch nn.Linear shapes [out, in]."""
    keys = jax.random.split(key, 10)

    def lin(kw, kb, out_d, in_d):
        bound = 1.0 / jnp.sqrt(in_d)
        w = jax.random.uniform(kw, (out_d, in_d), jnp.float32, -bound, bound)
        b = jax.random.uniform(kb, (out_d,), jnp.float32, -bound, bound)
        return w, b

    w1, b1 = lin(keys[0], keys[1], hidden_dim1, input_dim)
    w2, b2 = lin(keys[2], keys[3], hidden_dim2, hidden_dim1)
    w3, b3 = lin(keys[4], keys[5], hidden_dim3, hidden_dim2)
    mw, mb = lin(keys[6], keys[7], latent_dim, hidden_dim3)
    vw, vb = lin(keys[8], keys[9], latent_dim, hidden_dim3)
    return {
        "w1": w1, "b1": b1,
        "w2": w2, "b2": b2,
        "w3": w3, "b3": b3,
        "mu_w": mw, "mu_b": mb,
        "var_w": vw, "var_b": vb,
    }


def encoder_ref(x, params):
    """Pure-JAX f32 reference mirroring the PyTorch forward."""
    h1 = jnp.maximum(x @ params["w1"].T + params["b1"], 0.0)
    h2 = jnp.maximum(h1 @ params["w2"].T + params["b2"], 0.0)
    h3 = jnp.maximum(h2 @ params["w3"].T + params["b3"], 0.0)
    z_mu = h3 @ params["mu_w"].T + params["mu_b"]
    z_var = h3 @ params["var_w"].T + params["var_b"]
    return z_mu, z_var


if __name__ == "__main__":
    # Small shapes consistent with the module (hidden_dim1=256, hidden_dim2=128).
    batch = 8
    input_dim = 32
    hidden_dim1 = 256
    hidden_dim2 = 128
    hidden_dim3 = 64
    latent_dim = 16

    key = jax.random.PRNGKey(0)
    k_x, k_p = jax.random.split(key)
    x = jax.random.normal(k_x, (batch, input_dim), jnp.float32)
    params = init_params(k_p, input_dim, hidden_dim1, hidden_dim2, hidden_dim3, latent_dim)

    # One-time parameter preparation (transposes / bf16 cast / head padding
    # hoisted out of the per-call path).
    prep = prepare_params(params)

    z_mu, z_var = encoder_forward(x, prep)
    jax.block_until_ready((z_mu, z_var))

    # Correctness check against pure-JAX f32 reference (bf16 compute tolerance).
    ref_mu, ref_var = encoder_ref(x, params)
    assert z_mu.shape == ref_mu.shape and z_var.shape == ref_var.shape
    assert jnp.allclose(z_mu, ref_mu, atol=5e-2, rtol=5e-2)
    assert jnp.allclose(z_var, ref_var, atol=5e-2, rtol=5e-2)

    print("KERNEL_OK")
</pallas_src>

<mosaic_0001>
module attributes {stable_mosaic.version = 11 : i64} {
  func.func @encoder_kernel(%arg0: i32, %arg1: memref<8x32xf32, #tpu.memory_space<vmem>>, %arg2: memref<32x256xbf16, #tpu.memory_space<vmem>>, %arg3: memref<1x256xf32, #tpu.memory_space<vmem>>, %arg4: memref<256x128xbf16, #tpu.memory_space<vmem>>, %arg5: memref<1x128xf32, #tpu.memory_space<vmem>>, %arg6: memref<128x64xbf16, #tpu.memory_space<vmem>>, %arg7: memref<1x64xf32, #tpu.memory_space<vmem>>, %arg8: memref<64x128xbf16, #tpu.memory_space<vmem>>, %arg9: memref<1x128xf32, #tpu.memory_space<vmem>>, %arg10: memref<8x128xf32, #tpu.memory_space<vmem>>) attributes {dimension_semantics = [#tpu.dimension_semantics<parallel>], iteration_bounds = array<i64: 1>, scalar_prefetch = 0 : i64, scratch_operands = 0 : i64, tpu.core_type = #tpu.core_type<tc>, window_params = [{transform_indices = @transform_0, window_bounds = array<i64: 8, 32>}, {pipeline_mode = #tpu.pipeline_mode<synchronous>, transform_indices = @transform_1, window_bounds = array<i64: 32, 256>}, {pipeline_mode = #tpu.pipeline_mode<synchronous>, transform_indices = @transform_2, window_bounds = array<i64: 1, 256>}, {pipeline_mode = #tpu.pipeline_mode<synchronous>, transform_indices = @transform_3, window_bounds = array<i64: 256, 128>}, {pipeline_mode = #tpu.pipeline_mode<synchronous>, transform_indices = @transform_4, window_bounds = array<i64: 1, 128>}, {pipeline_mode = #tpu.pipeline_mode<synchronous>, transform_indices = @transform_5, window_bounds = array<i64: 128, 64>}, {pipeline_mode = #tpu.pipeline_mode<synchronous>, transform_indices = @transform_6, window_bounds = array<i64: 1, 64>}, {pipeline_mode = #tpu.pipeline_mode<synchronous>, transform_indices = @transform_7, window_bounds = array<i64: 64, 128>}, {pipeline_mode = #tpu.pipeline_mode<synchronous>, transform_indices = @transform_8, window_bounds = array<i64: 1, 128>}, {transform_indices = @transform_9, window_bounds = array<i64: 8, 128>}]} {
    %c0 = arith.constant 0 : index
    %c0_0 = arith.constant 0 : index
    %0 = vector.load %arg1[%c0, %c0_0] : memref<8x32xf32, #tpu.memory_space<vmem>>, vector<8x32xf32>
    %1 = arith.truncf %0 : vector<8x32xf32> to vector<8x32xbf16>
    %c0_1 = arith.constant 0 : index
    %c0_2 = arith.constant 0 : index
    %2 = vector.load %arg2[%c0_1, %c0_2] : memref<32x256xbf16, #tpu.memory_space<vmem>>, vector<32x256xbf16>
    %cst = arith.constant dense<0.000000e+00> : vector<8x256xf32>
    %3 = tpu.matmul %1, %2, %cst {dimension_numbers = #tpu.dot_dimension_numbers<[1], [0], [0], [1], [0, 0, 1, 1], [], []>} : vector<8x32xbf16>, vector<32x256xbf16>, vector<8x256xf32> -> vector<8x256xf32>
    %c0_3 = arith.constant 0 : index
    %c0_4 = arith.constant 0 : index
    %4 = vector.load %arg3[%c0_3, %c0_4] : memref<1x256xf32, #tpu.memory_space<vmem>>, vector<1x256xf32>
    %5 = vector.broadcast %4 : vector<1x256xf32> to vector<8x256xf32>
    %6 = arith.addf %3, %5 : vector<8x256xf32>
    %cst_5 = arith.constant 0.000000e+00 : f32
    %7 = vector.broadcast %cst_5 : f32 to vector<8x256xf32>
    %8 = arith.maximumf %6, %7 : vector<8x256xf32>
    %9 = arith.truncf %8 : vector<8x256xf32> to vector<8x256xbf16>
    %c0_6 = arith.constant 0 : index
    %c0_7 = arith.constant 0 : index
    %10 = vector.load %arg4[%c0_6, %c0_7] : memref<256x128xbf16, #tpu.memory_space<vmem>>, vector<256x128xbf16>
    %cst_8 = arith.constant dense<0.000000e+00> : vector<8x128xf32>
    %11 = tpu.matmul %9, %10, %cst_8 {dimension_numbers = #tpu.dot_dimension_numbers<[1], [0], [0], [1], [0, 0, 1, 1], [], []>} : vector<8x256xbf16>, vector<256x128xbf16>, vector<8x128xf32> -> vector<8x128xf32>
    %c0_9 = arith.constant 0 : index
    %c0_10 = arith.constant 0 : index
    %12 = vector.load %arg5[%c0_9, %c0_10] : memref<1x128xf32, #tpu.memory_space<vmem>>, vector<1x128xf32>
    %13 = vector.broadcast %12 : vector<1x128xf32> to vector<8x128xf32>
    %14 = arith.addf %11, %13 : vector<8x128xf32>
    %cst_11 = arith.constant 0.000000e+00 : f32
    %15 = vector.broadcast %cst_11 : f32 to vector<8x128xf32>
    %16 = arith.maximumf %14, %15 : vector<8x128xf32>
    %17 = arith.truncf %16 : vector<8x128xf32> to vector<8x128xbf16>
    %c0_12 = arith.constant 0 : index
    %c0_13 = arith.constant 0 : index
    %18 = vector.load %arg6[%c0_12, %c0_13] : memref<128x64xbf16, #tpu.memory_space<vmem>>, vector<128x64xbf16>
    %cst_14 = arith.constant dense<0.000000e+00> : vector<8x64xf32>
    %19 = tpu.matmul %17, %18, %cst_14 {dimension_numbers = #tpu.dot_dimension_numbers<[1], [0], [0], [1], [0, 0, 1, 1], [], []>} : vector<8x128xbf16>, vector<128x64xbf16>, vector<8x64xf32> -> vector<8x64xf32>
    %c0_15 = arith.constant 0 : index
    %c0_16 = arith.constant 0 : index
    %20 = vector.load %arg7[%c0_15, %c0_16] : memref<1x64xf32, #tpu.memory_space<vmem>>, vector<1x64xf32>
    %21 = vector.broadcast %20 : vector<1x64xf32> to vector<8x64xf32>
    %22 = arith.addf %19, %21 : vector<8x64xf32>
    %cst_17 = arith.constant 0.000000e+00 : f32
    %23 = vector.broadcast %cst_17 : f32 to vector<8x64xf32>
    %24 = arith.maximumf %22, %23 : vector<8x64xf32>
    %25 = arith.truncf %24 : vector<8x64xf32> to vector<8x64xbf16>
    %c0_18 = arith.constant 0 : index
    %c0_19 = arith.constant 0 : index
    %26 = vector.load %arg8[%c0_18, %c0_19] : memref<64x128xbf16, #tpu.memory_space<vmem>>, vector<64x128xbf16>
    %cst_20 = arith.constant dense<0.000000e+00> : vector<8x128xf32>
    %27 = tpu.matmul %25, %26, %cst_20 {dimension_numbers = #tpu.dot_dimension_numbers<[1], [0], [0], [1], [0, 0, 1, 1], [], []>} : vector<8x64xbf16>, vector<64x128xbf16>, vector<8x128xf32> -> vector<8x128xf32>
    %c0_21 = arith.constant 0 : index
    %c0_22 = arith.constant 0 : index
    %28 = vector.load %arg9[%c0_21, %c0_22] : memref<1x128xf32, #tpu.memory_space<vmem>>, vector<1x128xf32>
    %29 = vector.broadcast %28 : vector<1x128xf32> to vector<8x128xf32>
    %30 = arith.addf %27, %29 : vector<8x128xf32>
    %c0_23 = arith.constant 0 : index
    %c0_24 = arith.constant 0 : index
    %31 = vector.load %arg10[%c0_23, %c0_24] : memref<8x128xf32, #tpu.memory_space<vmem>>, vector<8x128xf32>
    tpu.vector_store %arg10[%c0_23, %c0_24], %30 {strides = array<i32>} : memref<8x128xf32, #tpu.memory_space<vmem>>, vector<8x128xf32>,
    return
  }
  func.func @transform_0(%arg0: i32) -> (i32, i32) {
    %c0_i32 = arith.constant 0 : i32
    %c0_i32_0 = arith.constant 0 : i32
    return %arg0, %c0_i32 : i32, i32
  }
  func.func @transform_1(%arg0: i32) -> (i32, i32) {
    %c0_i32 = arith.constant 0 : i32
    %c0_i32_0 = arith.constant 0 : i32
    %c0_i32_1 = arith.constant 0 : i32
    return %c0_i32, %c0_i32_0 : i32, i32
  }
  func.func @transform_2(%arg0: i32) -> (i32, i32) {
    %c0_i32 = arith.constant 0 : i32
    %c0_i32_0 = arith.constant 0 : i32
    %c0_i32_1 = arith.constant 0 : i32
    return %c0_i32, %c0_i32_0 : i32, i32
  }
  func.func @transform_3(%arg0: i32) -> (i32, i32) {
    %c0_i32 = arith.constant 0 : i32
    %c0_i32_0 = arith.constant 0 : i32
    %c0_i32_1 = arith.constant 0 : i32
    return %c0_i32, %c0_i32_0 : i32, i32
  }
  func.func @transform_4(%arg0: i32) -> (i32, i32) {
    %c0_i32 = arith.constant 0 : i32
    %c0_i32_0 = arith.constant 0 : i32
    %c0_i32_1 = arith.constant 0 : i32
    return %c0_i32, %c0_i32_0 : i32, i32
  }
  func.func @transform_5(%arg0: i32) -> (i32, i32) {
    %c0_i32 = arith.constant 0 : i32
    %c0_i32_0 = arith.constant 0 : i32
    %c0_i32_1 = arith.constant 0 : i32
    return %c0_i32, %c0_i32_0 : i32, i32
  }
  func.func @transform_6(%arg0: i32) -> (i32, i32) {
    %c0_i32 = arith.constant 0 : i32
    %c0_i32_0 = arith.constant 0 : i32
    %c0_i32_1 = arith.constant 0 : i32
    return %c0_i32, %c0_i32_0 : i32, i32
  }
  func.func @transform_7(%arg0: i32) -> (i32, i32) {
    %c0_i32 = arith.constant 0 : i32
    %c0_i32_0 = arith.constant 0 : i32
    %c0_i32_1 = arith.constant 0 : i32
    return %c0_i32, %c0_i32_0 : i32, i32
  }
  func.func @transform_8(%arg0: i32) -> (i32, i32) {
    %c0_i32 = arith.constant 0 : i32
    %c0_i32_0 = arith.constant 0 : i32
    %c0_i32_1 = arith.constant 0 : i32
    return %c0_i32, %c0_i32_0 : i32, i32
  }
  func.func @transform_9(%arg0: i32) -> (i32, i32) {
    %c0_i32 = arith.constant 0 : i32
    %c0_i32_0 = arith.constant 0 : i32
    return %arg0, %c0_i32 : i32, i32
  }
}

</mosaic_0001>

<bundles_post_ra>
// kernel: tpu_custom_call.1
= control target key start
LH: loop header
LB: loop body
LE: loop exit
PB: predicated region body
PF: predicated region fallthrough
CT: control target
= control target key end

     0   :  { %14 = vsyncpa [#allocation3], 0  ;;  %s876_s0 = inlined_call_operand.vmem [shape: f32[8,32], index: 0, kind: input, shape index: {}]   ;;  %s877_s1 = inlined_call_operand.vmem [shape: bf16[32,256], index: 1, kind: input, shape index: {}]   ;;  %s878_s2 = inlined_call_operand.vmem [shape: f32[1,256], index: 2, kind: input, shape index: {}]   ;;  %s879_s3 = inlined_call_operand.hbm [shape: bf16[256,128], index: 3, kind: input, shape index: {}]   ;;  %s880_s4 = inlined_call_operand.vmem [shape: f32[1,128], index: 4, kind: input, shape index: {}]   ;;  %s881_s5 = inlined_call_operand.vmem [shape: bf16[128,64], index: 5, kind: input, shape index: {}]   ;;  %s882_s6 = inlined_call_operand.vmem [shape: f32[1,64], index: 6, kind: input, shape index: {}]   ;;  %s883_s7 = inlined_call_operand.vmem [shape: bf16[64,128], index: 7, kind: input, shape index: {}]   ;;  %s884_s8 = inlined_call_operand.vmem [shape: f32[1,128], index: 8, kind: input, shape index: {}]   ;;  %s885_s9 = inlined_call_operand.hbm [shape: f32[8,128], index: 9, kind: output, shape index: {}]  }
   0x1   :  { %15 = vsyncpa [#allocation4], 0  ;;  %s718_s30 = smov [#allocation2]   ;;  %s670_s13 = scalar_lea.hbm %s879_s3, 2048 }
   0x2   :  { %s27_s10 = sshll.u32 %s718_s30, 4  ;;  %p671_p0 = scmp.ne.s32.totalorder %s879_s3, %s670_s13  ;;  %s28_s10 = int_to_ptr.vmem [resolvable:$true] %s27_s10 }
   0x3   :  { %p674_p1 = scmp.lt.u32.totalorder %s670_s13, %s879_s3 }
   0x5   :  { %p676_p2 = pnand %p674_p1, %p671_p0 }
   0x7   :  { %679 = shalt.err (!%p676_p2)
}
   0x8   :  { %s680_s18 = scalar_lea.vmem %s28_s10, 2048  ;;  %p685_p4 = scmp.lt.s32.totalorder %s28_s10, %s28_s10 }
   0x9   :  { %p681_p3 = scmp.ne.s32.totalorder %s28_s10, %s680_s18  ;;  %p686_p5 = scmp.lt.s32.totalorder %s680_s18, %s680_s18 }
   0xb   :  { %p687_p6 = por %p686_p5, %p685_p4 }
   0xd   :  { %p688_p7 = pnand %p687_p6, %p681_p3 }
   0xf   :  { %691 = shalt.err (!%p688_p7)
}
  0x10   :  { %s719_s19 = smov 64   ;;  %s720_s20 = smov 4  }
  0x11   :  { %33 = dma.hbm_to_vmem [thread:$0]  %s879_s3, 2048, %s28_s10, [#allocation3], %s719_s19, %s719_s19, %s720_s20  }
  0x12   :  { %714 = dma.done.wait [#allocation3], 2048  }
  0x13   :  { %715 = vsyncadd [#allocation3], 4294965248  ;;  %v721_v0 = vmov 0   ;;  %v636_v1 = vld [vmem:[%s877_s1 + $0x4] ss:$8 sps:$4 sm:$0xff]   ;;  %vm86_vm0 = vcmask 261120   ;;  %v56_v30 = vlaneseq }
  0x14   :  { %122 = vmatprep.mubr.bf16.mxu0 %v721_v0  ;;  %v638_v2 = vld [vmem:[%s877_s1] ss:$8 sps:$4 sm:$0xff]   ;;  %90 = vmatprep.subr.bf16.mxu0 %v636_v1  ;;  %v639_v3 = vld [vmem:[%s877_s1 + $0x14] ss:$8 sps:$4 sm:$0xff]   ;;  %v641_v4 = vld [vmem:[%s877_s1 + $0x10] ss:$8 sps:$4 sm:$0xff]  }
  0x15   :  { %v48_v5 = vld [vmem:[%s876_s0] sm:$0xff]  ;;  %91 = vmatpush1.bf16.msra.mxu0 %v638_v2  ;;  %v644_v8 = vld [vmem:[#allocation2 + $0x48] sm:$0xff]   ;;  %v646_v11 = vld [vmem:[#allocation2 + $0x50] sm:$0xff]   ;;  %v722_v24 = vmov 0.0   ;;  %v57_v31 = vshrl.u32 %v56_v30, 7  ;;  %vm723_vm1 = vmmov 0  }
  0x16   :  { %v642_v6 = vld [vmem:[#allocation2 + $0x40] sm:$0xff]   ;;  %92 = vmatprep.subr.bf16.mxu0 %v639_v3  ;;  %v49_v9 = vpack.c.bf16 %v48_v5, %v48_v5  ;;  %v645_v10 = vld [vmem:[#allocation2 + $0x8] sm:$0xff]   ;;  %v647_v12 = vld [vmem:[#allocation2 + $0x10] sm:$0xff]   ;;  %vm464_vm2 = vcmask 523264   ;;  %s724_s14 = smov [#allocation5]  }
  0x17   :  { %v643_v7 = vld [vmem:[#allocation2] sm:$0xff]   ;;  %561 = vmatprep.subr.bf16.mxu1 %v642_v6  ;;  %v648_v13 = vld [vmem:[#allocation2 + $0x58] sm:$0xff]   ;;  %v652_v17 = vld [vmem:[#allocation2 + $0x68] sm:$0xff]   ;;  %v58_v32 = vsub.s32 0, %v57_v31  ;;  %v62_v34 = vsub.s32 1, %v57_v31 }
  0x18   :  { %562 = vmatpush3.bf16.msra.mxu1 %v643_v7  ;;  %v649_v14 = vld [vmem:[#allocation2 + $0x18] sm:$0xff]   ;;  %v650_v15 = vld [vmem:[#allocation2 + $0x60] sm:$0xff]   ;;  %v653_v18 = vld [vmem:[#allocation2 + $0x28] sm:$0xff]  }
  0x19   :  { %93 = vmatpush1.bf16.msra.mxu0 %v641_v4  ;;  %563 = vmatprep.subr.bf16.mxu1 %v644_v8  ;;  %v651_v16 = vld [vmem:[#allocation2 + $0x20] sm:$0xff]   ;;  %v654_v19 = vld [vmem:[#allocation2 + $0x70] sm:$0xff]   ;;  %v656_v21 = vld [vmem:[#allocation2 + $0x78] sm:$0xff]  }
  0x1a   :  { %v655_v20 = vld [vmem:[#allocation2 + $0x30] sm:$0xff]   ;;  %v657_v22 = vld [vmem:[#allocation2 + $0x38] sm:$0xff]   ;;  %v658_v23 = vld [vmem:[%s881_s5] sm:$0xff]   ;;  %597 = vmatprep.subr.bf16.mxu0 %v722_v24 }
  0x1b   :  { %v659_v25 = vld [vmem:[%s881_s5 + $0x8] sm:$0xff]   ;;  %v660_v26 = vld [vmem:[%s881_s5 + $0x10] sm:$0xff]   ;;  %v661_v27 = vld [vmem:[%s881_s5 + $0x18] sm:$0xff]  }
  0x1c   :  { %528 = vmatmul.mubr.msk.bf16.vlgmr.msra.gmra.mrb[0].mxu0 %vm86_vm0, %v49_v9  ;;  %564 = vmatpush3.bf16.msra.mxu1 %v645_v10  ;;  %v662_v28 = vld [vmem:[%s881_s5 + $0x20] sm:$0xff]   ;;  %v663_v29 = vld [vmem:[%s881_s5 + $0x28] sm:$0xff]   ;;  %v664_v47 = vld [vmem:[%s881_s5 + $0x30] sm:$0xff]  }
  0x1d   :  { %565 = vmatprep.subr.bf16.mxu1 %v646_v11  ;;  %598 = vmatpush3.bf16.msra.mxu0 %v658_v23  ;;  %v54_v33 = vld [vmem:[%s878_s2] sm:$0x3]  ;;  %v665_v48 = vld [vmem:[%s881_s5 + $0x38] sm:$0xff]   ;;  %v667_v50 = vld [vmem:[%s883_s7 + $0x8] sm:$0xff]  }
  0x1e   :  { %599 = vmatprep.subr.bf16.mxu0 %v722_v24  ;;  %v59_v35 = vrot.slane %v54_v33, %v58_v32  ;;  %v63_v36 = vrot.slane %v54_v33, %v62_v34  ;;  %613 = vmatprep.mubr.msk.bf16.mxu0 %vm723_vm1, %v722_v24  ;;  %v666_v49 = vld [vmem:[%s883_s7] sm:$0xff]   ;;  %v668_v60 = vld [vmem:[%s883_s7 + $0x10] sm:$0xff]   ;;  %v669_v61 = vld [vmem:[%s883_s7 + $0x18] sm:$0xff]   ;;  %s515_s7 = sshll.u32 %s724_s14, 4  ;;  %s516_s7 = int_to_ptr.vmem [resolvable:$true] %s515_s7 }
  0x1f   :  { %v529_v52 = vld [vmem:[%s880_s4] ss:$0 sm:$0xff]  ;;  %p697_p9 = scmp.lt.s32.totalorder %s516_s7, %s516_s7 }
  0x20   :  { %566 = vmatpush3.bf16.msra.mxu1 %v647_v12  ;;  %v546_v62 = vld [vmem:[%s882_s6] ss:$0 sm:$0xff]  ;;  %s692_s6 = scalar_lea.vmem %s516_s7, 128 }
  0x21   :  { %567 = vmatprep.subr.bf16.mxu1 %v648_v13  ;;  %600 = vmatpush3.bf16.msra.mxu0 %v659_v25  ;;  %v555_v6 = vld [vmem:[%s884_s8] ss:$0 sm:$0xff]  ;;  %p693_p8 = scmp.ne.s32.totalorder %s516_s7, %s692_s6  ;;  %p698_p10 = scmp.lt.s32.totalorder %s692_s6, %s692_s6 }
  0x22   :  { %601 = vmatprep.subr.bf16.mxu0 %v722_v24 }
  0x23   :  { %p699_p11 = por %p698_p10, %p697_p9 }
  0x24   :  { %568 = vmatpush3.bf16.msra.mxu1 %v649_v14 }
  0x25   :  { %569 = vmatprep.subr.bf16.mxu1 %v650_v15  ;;  %602 = vmatpush3.bf16.msra.mxu0 %v660_v26  ;;  %p700_p12 = pnand %p699_p11, %p693_p8 }
  0x26   :  { %603 = vmatprep.subr.bf16.mxu0 %v722_v24 }
  0x28   :  { %570 = vmatpush3.bf16.msra.mxu1 %v651_v16 }
  0x29   :  { %571 = vmatprep.subr.bf16.mxu1 %v652_v17  ;;  %604 = vmatpush3.bf16.msra.mxu0 %v661_v27 }
  0x2a   :  { %605 = vmatprep.subr.bf16.mxu0 %v722_v24 }
  0x2c   :  { %572 = vmatpush3.bf16.msra.mxu1 %v653_v18 }
  0x2d   :  { %573 = vmatprep.subr.bf16.mxu1 %v654_v19  ;;  %606 = vmatpush3.bf16.msra.mxu0 %v662_v28 }
  0x2e   :  { %607 = vmatprep.subr.bf16.mxu0 %v722_v24 }
  0x30   :  { %574 = vmatpush3.bf16.msra.mxu1 %v655_v20 }
  0x31   :  { %575 = vmatprep.subr.bf16.mxu1 %v656_v21  ;;  %608 = vmatpush3.bf16.msra.mxu0 %v663_v29 }
  0x32   :  { %609 = vmatprep.subr.bf16.mxu0 %v722_v24 }
  0x34   :  { %576 = vmatpush3.bf16.msra.mxu1 %v657_v22 }
  0x35   :  { %617 = vmatprep.subr.bf16.mxu1 %v722_v24  ;;  %610 = vmatpush3.bf16.msra.mxu0 %v664_v47 }
  0x36   :  { %611 = vmatprep.subr.bf16.mxu0 %v722_v24 }
  0x39   :  { %612 = vmatpush3.bf16.msra.mxu0 %v665_v48 }
  0xef   :  { %v124_v37 = vpop.f32.mrb[0].mxu0 }
  0xf0   :  { %v125_v38 = vadd.f32 %v124_v37, %v59_v35  ;;  %v126_v39 = vpop.f32.mrb[1].mxu0 }
  0xf1   :  { %v127_v40 = vadd.f32 %v126_v39, %v63_v36  ;;  %v128_v41 = vpop.f32.mrb[2].mxu0 }
  0xf2   :  { %v131_v42 = vmax.f32 %v125_v38, 0.0  ;;  %v129_v43 = vpop.f32.mrb[3].mxu0 }
  0xf3   :  { %v132_v44 = vmax.f32 %v127_v40, 0.0 }
  0xf4   :  { %v133_v46 = vpack.c.bf16 %v131_v42, %v131_v42 }
  0xf5   :  { %v134_v45 = vpack.c.bf16 %v132_v44, %v132_v44 }
  0xf7   :  { %302 = vmatprep.mubr.bf16.mxu1 %v134_v45 }
  0xf8   :  { %303 = vmatmul.mubr.bf16.vlgmr.msra.gmra.mrb[0].mxu1 %v133_v46 }
  0xf9   :  { %625 = vmatprep.mubr.msk.bf16.mxu1 %vm723_vm1, %v722_v24  ;;  %618 = vmatpush3.bf16.msra.mxu1 %v666_v49 }
  0xfa   :  { %619 = vmatprep.subr.bf16.mxu1 %v722_v24 }
  0xfd   :  { %620 = vmatpush3.bf16.msra.mxu1 %v667_v50 }
  0xfe   :  { %621 = vmatprep.subr.bf16.mxu1 %v722_v24 }
 0x101   :  { %622 = vmatpush3.bf16.msra.mxu1 %v668_v60 }
 0x102   :  { %623 = vmatprep.subr.bf16.mxu1 %v722_v24 }
 0x105   :  { %624 = vmatpush3.bf16.msra.mxu1 %v669_v61 }
 0x1cb   :  { %v577_v51 = vpop.f32.mrb[0].mxu1 }
 0x1cc   :  { %v578_v53 = vpop.f32.mrb[1].mxu1 }
 0x1cd   :  { %v579_v54 = vadd.f32 %v578_v53, %v577_v51  ;;  %v580_v55 = vpop.f32.mrb[2].mxu1 }
 0x1ce   :  { %v581_v56 = vpop.f32.mrb[3].mxu1 }
 0x1cf   :  { %v305_v57 = vadd.f32 %v579_v54, %v529_v52 }
 0x1d1   :  { %v310_v58 = vmax.f32 %v305_v57, 0.0 }
 0x1d3   :  { %v311_v59 = vpack.c.bf16 %v310_v58, %v310_v58 }
 0x1d5   :  { %614 = vmatmul.mubr.bf16.vlgmr.msra.gmra.mrb[4].mxu0 %v311_v59 }
 0x2a8   :  { %v417_v63 = vpop.f32.mrb[4].mxu0 }
 0x2a9   :  { %v418_v0 = vadd.f32 %v546_v62, %v417_v63  ;;  %v615_v1 = vpop.f32.mrb[5].mxu0 }
 0x2aa   :  { %v420_v2 = vpop.f32.mrb[6].mxu0 }
 0x2ab   :  { %v423_v3 = vmax.f32 %v418_v0, 0.0  ;;  %v616_v4 = vpop.f32.mrb[7].mxu0 }
 0x2ad   :  { %v424_v5 = vpack.c.bf16 %v423_v3, %v423_v3 }
 0x2af   :  { %626 = vmatmul.mubr.msk.bf16.vlgmr.msra.gmra.mrb[4].mxu1 %vm464_vm2, %v424_v5 }
 0x382   :  { %v502_v7 = vpop.f32.mrb[4].mxu1 }
 0x383   :  { %v503_v8 = vadd.f32 %v555_v6, %v502_v7  ;;  %v627_v9 = vpop.f32.mrb[5].mxu1 }
 0x384   :  { %v505_v10 = vpop.f32.mrb[6].mxu1 }
 0x385   :  { %508 = vst [vmem:[#allocation5] sm:$0xff] %v503_v8  ;;  %v628_v11 = vpop.f32.mrb[7].mxu1 }
 0x386   :  { %703 = shalt.err (!%p700_p12)
}
 0x387   :  { %s704_s8 = scalar_lea.hbm %s885_s9, 128 }
 0x388   :  { %p705_p13 = scmp.ne.s32.totalorder %s885_s9, %s704_s8  ;;  %p708_p0 = scmp.lt.u32.totalorder %s704_s8, %s885_s9 }
 0x38a   :  { %p710_p1 = pnand %p708_p0, %p705_p13 }
 0x38c   :  { %713 = shalt.err (!%p710_p1)
}
 0x38d   :  { %518 = dma.vmem_to_hbm [thread:$0]  %s516_s7, 128, %s885_s9, [#allocation4]  }
 0x38e   :  { %716 = dma.done.wait [#allocation4], 128  }
 0x38f   :  { %717 = vsyncadd [#allocation4], 4294967168 }
 0x390   :  { %522 = vsyncpa [#allocation3], 1 }
 0x391   :  { %523 = vsyncpa [#allocation4], 1 }

</bundles_post_ra>
